<compile_context>
chip_gen: v7x
topology: tpu7x:2x2x1
jax: 0.10.0
libtpu: 0.0.40
codegen_flags: <defaults>
</compile_context>

<pallas_src>
import jax
import jax.numpy as jnp
from jax import lax
from jax.experimental import pallas as pl
from jax.experimental.pallas import tpu as pltpu

BN_EPS = 1e-5
_VMEM_LIMIT = 32 * 1024 * 1024        # raises v5e's 16 MiB default; safe on v6e/v7x
_TILE_VMEM_BUDGET = 16 * 1024 * 1024  # per-step (double-buffered) working-set target
_MAX_LANES_PER_STEP = 4096            # nN * tL cap (review: tiles well above 512 lanes)


def _conv_stats_kernel(x_ref, w_ref, y_ref, stats_ref):
    # x_ref:     (nN, C_in, tL)
    # w_ref:     (T_out, C_in)
    # y_ref:     (nN, T_out, tL)   conv output tile, stored in the input dtype
    # stats_ref: (1, 1, T_out, 2)  per-tile per-channel [sum, sum_of_squares] (f32)
    y = jnp.einsum(
        "oc,ncl->nol", w_ref[...], x_ref[...], preferred_element_type=jnp.float32
    )
    y_ref[...] = y.astype(y_ref.dtype)
    # Stats from the f32 accumulator (before any down-cast of y).
    ys = jnp.sum(y, axis=0)                        # (T_out, tL)
    y2s = jnp.sum(y * y, axis=0)                   # (T_out, tL)
    s1 = jnp.sum(ys, axis=1, keepdims=True)        # (T_out, 1)
    s2 = jnp.sum(y2s, axis=1, keepdims=True)       # (T_out, 1)
    stats_ref[0, 0] = jnp.concatenate([s1, s2], axis=1)   # single store


def _bn_apply_kernel(y_ref, scale_ref, shift_ref, o_ref):
    # y_ref/o_ref: (nN, T_out, tL); scale/shift: (T_out, 1) broadcast over batch & lanes.
    y = y_ref[...].astype(jnp.float32)
    o_ref[...] = (y * scale_ref[...][None] + shift_ref[...][None]).astype(o_ref.dtype)


def _choose_tiles(N, C_in, T_out, L, x_bytes):
    """Pick (nN, tL) so each grid step carries many lanes but stays inside VMEM."""
    y_bytes = x_bytes
    # Bytes per output-lane per step, double-buffered, pass-1 view (x + y + small stats)
    # plus pass-2 view folded in conservatively (y read + out write).
    per_lane = 2 * ((C_in + T_out) * x_bytes + 2 * T_out * y_bytes)
    lane_budget = max(128, _TILE_VMEM_BUDGET // per_lane)
    lane_budget = min(lane_budget, _MAX_LANES_PER_STEP)

    if L <= lane_budget:
        tL = L                                   # full-extent block: legal, no padding
    else:
        cap = max(128, (lane_budget // 128) * 128)
        tL = cap
        if L % 128 == 0:                         # prefer a tile that divides L: no pad copy
            t = 128
            while t <= cap:
                if L % t == 0:
                    tL = t
                t += 128
    L_pad = -(-L // tL) * tL
    nL = L_pad // tL

    # Batch blocking: amortize per-step overhead when L-tiles are short.
    max_nN = max(1, lane_budget // tL)
    nN = 1
    for d in range(min(N, max_nN), 0, -1):
        if N % d == 0:
            nN = d
            break
    return nN, tL, L_pad, nL


@jax.jit
def conv_reg_block(x_ncl, conv_w, conv_b, bn_gamma, bn_beta):
    """x_ncl: (N, C_in, L); conv_w: (T_out, C_in, 1); conv_b/gamma/beta: (T_out,).

    conv_b is accepted for API parity but unused: with training-mode BatchNorm the
    Conv1d bias is exactly cancelled by the batch-mean subtraction.
    """
    del conv_b
    N, C_in, L = x_ncl.shape
    T_out = conv_w.shape[0]
    x_bytes = jnp.dtype(x_ncl.dtype).itemsize

    nN, tL, L_pad, nL = _choose_tiles(N, C_in, T_out, L, x_bytes)
    nB = N // nN

    # Fallback pad only when L is ragged AND larger than the lane budget.
    xp = x_ncl if L_pad == L else jnp.pad(x_ncl, ((0, 0), (0, 0), (0, L_pad - L)))
    w2d = conv_w[:, :, 0]   # (T_out, C_in) — native orientation, no transposes

    # ---- Pass 1: Conv1d(k=1) matmul + per-tile BN partial statistics. ----
    y, stats = pl.pallas_call(
        _conv_stats_kernel,
        out_shape=(
            jax.ShapeDtypeStruct((N, T_out, L_pad), x_ncl.dtype),   # y in input dtype
            jax.ShapeDtypeStruct((nB, nL, T_out, 2), jnp.float32),
        ),
        grid=(nB, nL),
        in_specs=[
            pl.BlockSpec((nN, C_in, tL), lambda n, l: (n, 0, l)),
            pl.BlockSpec((T_out, C_in), lambda n, l: (0, 0)),
        ],
        out_specs=(
            pl.BlockSpec((nN, T_out, tL), lambda n, l: (n, 0, l)),
            pl.BlockSpec((1, 1, T_out, 2), lambda n, l: (n, l, 0, 0)),
        ),
        compiler_params=pltpu.CompilerParams(
            dimension_semantics=("parallel", "parallel"),
            vmem_limit_bytes=_VMEM_LIMIT,
        ),
    )(xp, w2d)

    # ---- Tiny combine (O(T_out) floats) + fold gamma/beta into scale/shift. ----
    totals = jnp.sum(stats, axis=(0, 1))                   # (T_out, 2)
    count = jnp.float32(N * L)                              # padded cols contribute zero
    mean = totals[:, 0] / count
    var = jnp.maximum(totals[:, 1] / count - mean * mean, 0.0)
    inv_std = lax.rsqrt(var + BN_EPS)
    scale_vec = bn_gamma.astype(jnp.float32) * inv_std
    shift_vec = bn_beta.astype(jnp.float32) - mean * scale_vec
    scale = scale_vec.reshape(T_out, 1)
    shift = shift_vec.reshape(T_out, 1)

    # ---- Pass 2: apply normalization; output aliases y's HBM buffer. ----
    out = pl.pallas_call(
        _bn_apply_kernel,
        out_shape=jax.ShapeDtypeStruct((N, T_out, L_pad), x_ncl.dtype),
        grid=(nB, nL),
        in_specs=[
            pl.BlockSpec((nN, T_out, tL), lambda n, l: (n, 0, l)),
            pl.BlockSpec((T_out, 1), lambda n, l: (0, 0)),
            pl.BlockSpec((T_out, 1), lambda n, l: (0, 0)),
        ],
        out_specs=pl.BlockSpec((nN, T_out, tL), lambda n, l: (n, 0, l)),
        input_output_aliases={0: 0},
        compiler_params=pltpu.CompilerParams(
            dimension_semantics=("parallel", "parallel"),
            vmem_limit_bytes=_VMEM_LIMIT,
        ),
    )(y, scale, shift)

    return out if L_pad == L else out[:, :, :L]   # (N, T_out, L), PyTorch NCL layout


def _reference(x_ncl, conv_w, conv_b, bn_gamma, bn_beta):
    """Pure-JAX reference mirroring PyTorch Conv1d(k=1, bias=True) + BatchNorm1d(train)."""
    y = jnp.einsum("ncl,oc->nol", x_ncl, conv_w[:, :, 0]) + conv_b[None, :, None]
    mean = jnp.mean(y, axis=(0, 2), keepdims=True)
    var = jnp.mean((y - mean) ** 2, axis=(0, 2), keepdims=True)  # biased, as PyTorch
    y_hat = (y - mean) / jnp.sqrt(var + BN_EPS)
    return y_hat * bn_gamma[None, :, None] + bn_beta[None, :, None]


if __name__ == "__main__":
    # Module hyper-params (small, consistent with __init__):
    t_inp, t_out, n_points, hidden_dim = 2, 8, 16, 16
    batch = 2
    c_in = hidden_dim * t_inp   # Conv1d in_channels = 32

    key = jax.random.PRNGKey(0)
    kx, kw, kb, kg, kbe = jax.random.split(key, 5)

    x = jax.random.normal(kx, (batch, c_in, n_points), dtype=jnp.float32)
    conv_w = jax.random.normal(kw, (t_out, c_in, 1), dtype=jnp.float32) * 0.05
    conv_b = jax.random.normal(kb, (t_out,), dtype=jnp.float32) * 0.05
    bn_gamma = 1.0 + 0.1 * jax.random.normal(kg, (t_out,), dtype=jnp.float32)
    bn_beta = 0.1 * jax.random.normal(kbe, (t_out,), dtype=jnp.float32)

    out = conv_reg_block(x, conv_w, conv_b, bn_gamma, bn_beta)
    out = jax.block_until_ready(out)

    ref = _reference(x, conv_w, conv_b, bn_gamma, bn_beta)
    assert out.shape == (batch, t_out, n_points)
    assert jnp.max(jnp.abs(out - ref)) < 1e-4, "mismatch vs reference"

    print("KERNEL_OK")
</pallas_src>

<mosaic_0001>
module attributes {stable_mosaic.version = 11 : i64} {
  func.func @_conv_stats_kernel(%arg0: i32, %arg1: i32, %arg2: memref<2x32x16xf32, #tpu.memory_space<vmem>>, %arg3: memref<8x32xf32, #tpu.memory_space<vmem>>, %arg4: memref<2x8x16xf32, #tpu.memory_space<vmem>>, %arg5: memref<1x1x8x2xf32, #tpu.memory_space<vmem>>) attributes {dimension_semantics = [#tpu.dimension_semantics<parallel>, #tpu.dimension_semantics<parallel>], iteration_bounds = array<i64: 1, 1>, scalar_prefetch = 0 : i64, scratch_operands = 0 : i64, tpu.core_type = #tpu.core_type<tc>, window_params = [{transform_indices = @transform_0, window_bounds = array<i64: 2, 32, 16>}, {pipeline_mode = #tpu.pipeline_mode<synchronous>, transform_indices = @transform_1, window_bounds = array<i64: 8, 32>}, {transform_indices = @transform_2, window_bounds = array<i64: 2, 8, 16>}, {transform_indices = @transform_3, window_bounds = array<i64: 1, 1, 8, 2>}]} {
    %c0 = arith.constant 0 : index
    %c0_0 = arith.constant 0 : index
    %0 = vector.load %arg3[%c0, %c0_0] : memref<8x32xf32, #tpu.memory_space<vmem>>, vector<8x32xf32>
    %c0_1 = arith.constant 0 : index
    %c0_2 = arith.constant 0 : index
    %c0_3 = arith.constant 0 : index
    %1 = vector.load %arg2[%c0_1, %c0_2, %c0_3] : memref<2x32x16xf32, #tpu.memory_space<vmem>>, vector<2x32x16xf32>
    "tpu.trace_start"() <{level = 10 : i32, message = "oc,ncl->nol"}> : () -> ()
    %cst = arith.constant dense<0.000000e+00> : vector<2x16x8xf32>
    %2 = tpu.matmul %1, %0, %cst {dimension_numbers = #tpu.dot_dimension_numbers<[1], [1], [0, 2], [0], [0, 0, 0, 2, 1, 0], [], []>} : vector<2x32x16xf32>, vector<8x32xf32>, vector<2x16x8xf32> -> vector<2x16x8xf32>
    %3 = tpu.transpose %2, [0, 2, 1] : vector<2x16x8xf32> -> vector<2x8x16xf32>
    "tpu.trace_stop"() : () -> ()
    %c0_4 = arith.constant 0 : index
    %c0_5 = arith.constant 0 : index
    %c0_6 = arith.constant 0 : index
    %4 = vector.load %arg4[%c0_4, %c0_5, %c0_6] : memref<2x8x16xf32, #tpu.memory_space<vmem>>, vector<2x8x16xf32>
    tpu.vector_store %arg4[%c0_4, %c0_5, %c0_6], %3 {strides = array<i32>} : memref<2x8x16xf32, #tpu.memory_space<vmem>>, vector<2x8x16xf32>,
    %cst_7 = arith.constant dense<0.000000e+00> : vector<8x16xf32>
    %5 = vector.multi_reduction <add>, %3, %cst_7 [0] : vector<2x8x16xf32> to vector<8x16xf32>
    %6 = arith.mulf %3, %3 : vector<2x8x16xf32>
    %cst_8 = arith.constant dense<0.000000e+00> : vector<8x16xf32>
    %7 = vector.multi_reduction <add>, %6, %cst_8 [0] : vector<2x8x16xf32> to vector<8x16xf32>
    %cst_9 = arith.constant dense<0.000000e+00> : vector<8xf32>
    %8 = vector.multi_reduction <add>, %5, %cst_9 [1] : vector<8x16xf32> to vector<8xf32>
    %9 = vector.shape_cast %8 : vector<8xf32> to vector<8x1xf32>
    %cst_10 = arith.constant dense<0.000000e+00> : vector<8xf32>
    %10 = vector.multi_reduction <add>, %7, %cst_10 [1] : vector<8x16xf32> to vector<8xf32>
    %11 = vector.shape_cast %10 : vector<8xf32> to vector<8x1xf32>
    %12 = tpu.concatenate %9, %11 in 1 : vector<8x1xf32>, vector<8x1xf32> -> vector<8x2xf32>
    %c0_11 = arith.constant 0 : index
    %c0_12 = arith.constant 0 : index
    %c0_13 = arith.constant 0 : index
    %c0_14 = arith.constant 0 : index
    %13 = vector.load %arg5[%c0_11, %c0_12, %c0_13, %c0_14] : memref<1x1x8x2xf32, #tpu.memory_space<vmem>>, vector<1x1x8x2xf32>
    %14 = vector.shape_cast %13 : vector<1x1x8x2xf32> to vector<8x2xf32>
    %15 = vector.shape_cast %12 : vector<8x2xf32> to vector<1x1x8x2xf32>
    tpu.vector_store %arg5[%c0_11, %c0_12, %c0_13, %c0_14], %15 {strides = array<i32>} : memref<1x1x8x2xf32, #tpu.memory_space<vmem>>, vector<1x1x8x2xf32>,
    return
  }
  func.func @transform_0(%arg0: i32, %arg1: i32) -> (i32, i32, i32) {
    %c0_i32 = arith.constant 0 : i32
    %c0_i32_0 = arith.constant 0 : i32
    return %arg0, %c0_i32, %arg1 : i32, i32, i32
  }
  func.func @transform_1(%arg0: i32, %arg1: i32) -> (i32, i32) {
    %c0_i32 = arith.constant 0 : i32
    %c0_i32_0 = arith.constant 0 : i32
    %c0_i32_1 = arith.constant 0 : i32
    return %c0_i32, %c0_i32_0 : i32, i32
  }
  func.func @transform_2(%arg0: i32, %arg1: i32) -> (i32, i32, i32) {
    %c0_i32 = arith.constant 0 : i32
    %c0_i32_0 = arith.constant 0 : i32
    return %arg0, %c0_i32, %arg1 : i32, i32, i32
  }
  func.func @transform_3(%arg0: i32, %arg1: i32) -> (i32, i32, i32, i32) {
    %c0_i32 = arith.constant 0 : i32
    %c0_i32_0 = arith.constant 0 : i32
    %c0_i32_1 = arith.constant 0 : i32
    return %arg0, %arg1, %c0_i32, %c0_i32_0 : i32, i32, i32, i32
  }
}

module attributes {stable_mosaic.version = 11 : i64} {
  func.func @_bn_apply_kernel(%arg0: i32, %arg1: i32, %arg2: memref<2x8x16xf32, #tpu.memory_space<vmem>>, %arg3: memref<8x1xf32, #tpu.memory_space<vmem>>, %arg4: memref<8x1xf32, #tpu.memory_space<vmem>>, %arg5: memref<2x8x16xf32, #tpu.memory_space<vmem>>) attributes {dimension_semantics = [#tpu.dimension_semantics<parallel>, #tpu.dimension_semantics<parallel>], iteration_bounds = array<i64: 1, 1>, scalar_prefetch = 0 : i64, scratch_operands = 0 : i64, tpu.core_type = #tpu.core_type<tc>, window_params = [{transform_indices = @transform_0, window_bounds = array<i64: 2, 8, 16>}, {pipeline_mode = #tpu.pipeline_mode<synchronous>, transform_indices = @transform_1, window_bounds = array<i64: 8, 1>}, {pipeline_mode = #tpu.pipeline_mode<synchronous>, transform_indices = @transform_2, window_bounds = array<i64: 8, 1>}, {transform_indices = @transform_3, window_bounds = array<i64: 2, 8, 16>}]} {
    %c0 = arith.constant 0 : index
    %c0_0 = arith.constant 0 : index
    %c0_1 = arith.constant 0 : index
    %0 = vector.load %arg2[%c0, %c0_0, %c0_1] : memref<2x8x16xf32, #tpu.memory_space<vmem>>, vector<2x8x16xf32>
    %c0_2 = arith.constant 0 : index
    %c0_3 = arith.constant 0 : index
    %1 = vector.load %arg3[%c0_2, %c0_3] : memref<8x1xf32, #tpu.memory_space<vmem>>, vector<8x1xf32>
    %2 = vector.shape_cast %1 : vector<8x1xf32> to vector<1x8x1xf32>
    %3 = vector.broadcast %2 : vector<1x8x1xf32> to vector<2x8x16xf32>
    %4 = arith.mulf %0, %3 : vector<2x8x16xf32>
    %c0_4 = arith.constant 0 : index
    %c0_5 = arith.constant 0 : index
    %5 = vector.load %arg4[%c0_4, %c0_5] : memref<8x1xf32, #tpu.memory_space<vmem>>, vector<8x1xf32>
    %6 = vector.shape_cast %5 : vector<8x1xf32> to vector<1x8x1xf32>
    %7 = vector.broadcast %6 : vector<1x8x1xf32> to vector<2x8x16xf32>
    %8 = arith.addf %4, %7 : vector<2x8x16xf32>
    %c0_6 = arith.constant 0 : index
    %c0_7 = arith.constant 0 : index
    %c0_8 = arith.constant 0 : index
    %9 = vector.load %arg5[%c0_6, %c0_7, %c0_8] : memref<2x8x16xf32, #tpu.memory_space<vmem>>, vector<2x8x16xf32>
    tpu.vector_store %arg5[%c0_6, %c0_7, %c0_8], %8 {strides = array<i32>} : memref<2x8x16xf32, #tpu.memory_space<vmem>>, vector<2x8x16xf32>,
    return
  }
  func.func @transform_0(%arg0: i32, %arg1: i32) -> (i32, i32, i32) {
    %c0_i32 = arith.constant 0 : i32
    %c0_i32_0 = arith.constant 0 : i32
    return %arg0, %c0_i32, %arg1 : i32, i32, i32
  }
  func.func @transform_1(%arg0: i32, %arg1: i32) -> (i32, i32) {
    %c0_i32 = arith.constant 0 : i32
    %c0_i32_0 = arith.constant 0 : i32
    %c0_i32_1 = arith.constant 0 : i32
    return %c0_i32, %c0_i32_0 : i32, i32
  }
  func.func @transform_2(%arg0: i32, %arg1: i32) -> (i32, i32) {
    %c0_i32 = arith.constant 0 : i32
    %c0_i32_0 = arith.constant 0 : i32
    %c0_i32_1 = arith.constant 0 : i32
    return %c0_i32, %c0_i32_0 : i32, i32
  }
  func.func @transform_3(%arg0: i32, %arg1: i32) -> (i32, i32, i32) {
    %c0_i32 = arith.constant 0 : i32
    %c0_i32_0 = arith.constant 0 : i32
    return %arg0, %c0_i32, %arg1 : i32, i32, i32
  }
}

</mosaic_0001>

<bundles_post_ra>
// kernel: conv_reg_block.2
= control target key start
LH: loop header
LB: loop body
LE: loop exit
PB: predicated region body
PF: predicated region fallthrough
CT: control target
= control target key end

     0   :  { %vm87_vm0 = vcmask 261120   ;;  %s414_s0 = inlined_call_operand.vmem [shape: f32[2,32,16], index: 0, kind: input, shape index: {}]   ;;  %s415_s1 = inlined_call_operand.vmem [shape: f32[8,32], index: 1, kind: input, shape index: {}]   ;;  %s416_s2 = inlined_call_operand.hbm [shape: f32[2,8,16], index: 2, kind: output, shape index: {0}]   ;;  %s417_s3 = inlined_call_operand.vmem [shape: f32[1,1,8,2], index: 3, kind: output, shape index: {1}]  }
   0x1   :  { %v19_v0 = vld [vmem:[%s414_s0 + $0x20] sm:$0xff]  ;;  %v20_v2 = vld [vmem:[%s414_s0 + $0x28] sm:$0xff] }
   0x2   :  { %v15_v1 = vld [vmem:[%s414_s0] sm:$0xff]  ;;  %55 = vxpose.xlu1.b32.start [1/4] (short) (narrow) %v19_v0, 16  ;;  %v16_v3 = vld [vmem:[%s414_s0 + $0x8] sm:$0xff] }
   0x3   :  { %23 = vxpose.xlu0.b32.start [1/4] (short) (narrow) %v15_v1, 16  ;;  %v14_v4 = vld [vmem:[%s415_s1] sm:$0xff] }
   0x4   :  { %303 = vmatprep.subr.msk.mxu0 %vm87_vm0, %v14_v4  ;;  %311 = vmatprep.subr.msk.mxu1 %vm87_vm0, %v14_v4 }
   0x5   :  { %9 = vsyncpa [#allocation3], 0  ;;  %304 = vmatpush3.xpose.msk.msra.mxu0 %vm87_vm0, %v14_v4  ;;  %312 = vmatpush3.xpose.msk.msra.mxu1 %vm87_vm0, %v14_v4  ;;  %v21_v5 = vld [vmem:[%s414_s0 + $0x30] sm:$0xff]  ;;  %v22_v7 = vld [vmem:[%s414_s0 + $0x38] sm:$0xff]  ;;  %vm252_vm1 = vcmask 130048  }
   0x6   :  { %56 = vxpose.xlu1.b32.cont [2/4] (short) (narrow) %v20_v2, 16  ;;  %v17_v6 = vld [vmem:[%s414_s0 + $0x10] sm:$0xff]  ;;  %v18_v8 = vld [vmem:[%s414_s0 + $0x18] sm:$0xff]  ;;  %s341_s0 = smov [#allocation2]  }
   0x7   :  { %24 = vxpose.xlu0.b32.cont [2/4] (short) (narrow) %v16_v3, 16  ;;  %s278_s29 = sshll.u32 %s341_s0, 4  ;;  %s279_s29 = int_to_ptr.vmem [resolvable:$true] %s278_s29 }
   0x8   :  { %s317_s30 = scalar_lea.vmem %s279_s29, 256  ;;  %p322_p1 = scmp.lt.s32.totalorder %s279_s29, %s279_s29 }
   0x9   :  { %p318_p0 = scmp.ne.s32.totalorder %s279_s29, %s317_s30  ;;  %p323_p2 = scmp.lt.s32.totalorder %s317_s30, %s317_s30 }
   0xa   :  { %57 = vxpose.xlu1.b32.cont [3/4] (short) (narrow) %v21_v5, 16 }
   0xb   :  { %25 = vxpose.xlu0.b32.cont [3/4] (short) (narrow) %v17_v6, 16  ;;  %p324_p3 = por %p323_p2, %p322_p1 }
   0xd   :  { %p325_p4 = pnand %p324_p3, %p318_p0 }
   0xe   :  { %58 = vxpose.xlu1.b32.end [4/4] (short) (narrow) %v22_v7, 16 }
   0xf   :  { %26 = vxpose.xlu0.b32.end [4/4] (short) (narrow) %v18_v8, 16 }
  0x82   :  { %v71_v9 = vpop.trf.xlu1 }
  0x83   :  { %v39_v10 = vpop.trf.xlu0  ;;  %308 = vmatprep.mubr.msk.f32.mxu1 %vm87_vm0, %v71_v9 }
  0x84   :  { %305 = vmatprep.mubr.msk.f32.mxu0 %vm87_vm0, %v39_v10 }
  0x86   :  { %v72_v11 = vpop.trf.xlu1 }
  0x87   :  { %v40_v12 = vpop.trf.xlu0  ;;  %309 = vmatmul.mubr.msk.f32.vlgmr.msra.gmra.mrb[0].mxu1 %vm87_vm0, %v72_v11 }
  0x88   :  { %306 = vmatmul.mubr.msk.f32.vlgmr.msra.gmra.mrb[0].mxu0 %vm87_vm0, %v40_v12 }
 0x15a   :  { %v310_v14 = vpop.f32.mrb[0].mxu1 }
 0x15b   :  { %v307_v13 = vpop.f32.mrb[0].mxu0  ;;  %v179_v16 = vpop.f32.mrb[1].mxu1 }
 0x15c   :  { %v169_v15 = vpop.f32.mrb[1].mxu0  ;;  %220 = vxpose.xlu1.b32.start [1/2] (short) (narrow) %v179_v16, 8 }
 0x15d   :  { %188 = vxpose.xlu0.b32.start [1/2] (short) (narrow) %v169_v15, 8 }
 0x160   :  { %221 = vxpose.xlu1.b32.end [2/2] (short) (narrow) %v310_v14, 8 }
 0x161   :  { %189 = vxpose.xlu0.b32.end [2/2] (short) (narrow) %v307_v13, 8 }
 0x1dc   :  { %v236_v17 = vpop.trf.xlu1 }
 0x1dd   :  { %v204_v18 = vpop.trf.xlu0  ;;  %254 = vst.msk [vmem:[#allocation2 + $0x8] sm:$0xff] %vm252_vm1, %v236_v17  ;;  %v259_v19 = vmul.f32 %v236_v17, %v236_v17  ;;  %v256_v22 = vsel %vm252_vm1, %v236_v17, 0.0 }
 0x1de   :  { %253 = vst.msk [vmem:[#allocation2] sm:$0xff] %vm252_vm1, %v204_v18  ;;  %v258_v20 = vmul.f32 %v204_v18, %v204_v18  ;;  %v255_v21 = vsel %vm252_vm1, %v204_v18, 0.0 }
 0x1df   :  { %v257_v23 = vadd.f32 %v256_v22, %v255_v21  ;;  %v261_v25 = vsel %vm252_vm1, %v259_v19, 0.0 }
 0x1e0   :  { %v260_v24 = vsel %vm252_vm1, %v258_v20, 0.0 }
 0x1e1   :  { %v263_v26 = vsel %vm252_vm1, %v257_v23, 0.0  ;;  %v262_v27 = vadd.f32 %v261_v25, %v260_v24 }
 0x1e2   :  { %264 = vadd.xlane.f32.xlu0 %v263_v26 }
 0x1e3   :  { %v266_v28 = vsel %vm252_vm1, %v262_v27, 0.0 }
 0x1e4   :  { %267 = vadd.xlane.f32.xlu1 %v266_v28 }
 0x1e5   :  { %328 = shalt.err (!%p325_p4)
}
 0x1e6   :  { %s329_s6 = scalar_lea.hbm %s416_s2, 256 }
 0x1e7   :  { %p330_p5 = scmp.ne.s32.totalorder %s416_s2, %s329_s6  ;;  %p333_p6 = scmp.lt.u32.totalorder %s329_s6, %s416_s2 }
 0x1e9   :  { %p335_p7 = pnand %p333_p6, %p330_p5 }
 0x1eb   :  { %338 = shalt.err (!%p335_p7)
}
 0x1ec   :  { %s342_s11 = smov 128   ;;  %s343_s12 = smov 8   ;;  %vm269_vm2 = vcmask 7168   ;;  %vm271_vm3 = vcmask 15360  }
 0x1ed   :  { %284 = dma.vmem_to_hbm [thread:$0]  %s279_s29, 256, %s416_s2, [#allocation3], %s342_s11, %s342_s11, %s343_s12  }
 0x26f   :  { %v265_v29 = vpop.xlane.xlu0 %264 }
 0x271   :  { %v268_v30 = vpop.xlane.xlu1 %267 }
 0x272   :  { %v270_v31 = vsel %vm269_vm2, %v265_v29, %v268_v30 }
 0x273   :  { %272 = vst.msk [vmem:[%s417_s3] sm:$0xff] %vm271_vm3, %v270_v31 }
 0x274   :  { %339 = dma.done.wait [#allocation3], 256  }
 0x275   :  { %340 = vsyncadd [#allocation3], 4294967040 }
 0x276   :  { %292 = vsyncpa [#allocation3], 1 }

// kernel: conv_reg_block.3
= control target key start
LH: loop header
LB: loop body
LE: loop exit
PB: predicated region body
PF: predicated region fallthrough
CT: control target
= control target key end

     0   :  { %8 = vsyncpa [#allocation3], 0  ;;  %s182_s0 = inlined_call_operand.hbm [shape: f32[2,8,16], index: 0, kind: input, shape index: {}, may-alias: {0,3}]   ;;  %s183_s1 = inlined_call_operand.vmem [shape: f32[8,1], index: 1, kind: input, shape index: {}]   ;;  %s184_s2 = inlined_call_operand.vmem [shape: f32[8,1], index: 2, kind: input, shape index: {}]   ;;  %s185_s3 = inlined_call_operand.hbm [shape: f32[2,8,16], index: 3, kind: output, shape index: {}, may-alias: {0,3}]  }
   0x1   :  { %9 = vsyncpa [#allocation4], 0  ;;  %s121_s12 = smov [#allocation2]   ;;  %s73_s16 = scalar_lea.hbm %s182_s0, 256 }
   0x2   :  { %s15_s13 = sshll.u32 %s121_s12, 4  ;;  %p74_p0 = scmp.ne.s32.totalorder %s182_s0, %s73_s16  ;;  %s16_s13 = int_to_ptr.vmem [resolvable:$true] %s15_s13 }
   0x3   :  { %p77_p1 = scmp.lt.u32.totalorder %s73_s16, %s182_s0 }
   0x5   :  { %p79_p2 = pnand %p77_p1, %p74_p0 }
   0x7   :  { %82 = shalt.err (!%p79_p2)
}
   0x8   :  { %s83_s21 = scalar_lea.vmem %s16_s13, 256  ;;  %p88_p4 = scmp.lt.s32.totalorder %s16_s13, %s16_s13 }
   0x9   :  { %p84_p3 = scmp.ne.s32.totalorder %s16_s13, %s83_s21  ;;  %p89_p5 = scmp.lt.s32.totalorder %s83_s21, %s83_s21 }
   0xb   :  { %p90_p6 = por %p89_p5, %p88_p4 }
   0xd   :  { %p91_p7 = pnand %p90_p6, %p84_p3 }
   0xf   :  { %94 = shalt.err (!%p91_p7)
}
  0x10   :  { %s122_s22 = smov 128   ;;  %s123_s23 = smov 8  }
  0x11   :  { %21 = dma.hbm_to_vmem [thread:$0]  %s182_s0, 256, %s16_s13, [#allocation3], %s122_s22, %s122_s22, %s123_s23  }
  0x12   :  { %117 = dma.done.wait [#allocation3], 256  }
  0x13   :  { %118 = vsyncadd [#allocation3], 4294967040  ;;  %v124_v0 = vmov 0   ;;  %v31_v1 = vld [vmem:[%s183_s1] sm:$0xff]  ;;  %v30_v5 = vld [vmem:[#allocation2 + $0x8] sm:$0xff]  ;;  %s125_s30 = smov [#allocation5]  }
  0x14   :  { %72 = vset.pattern.permute.xlu0 %v124_v0  ;;  %v39_v2 = vld [vmem:[%s184_s2] sm:$0xff]  ;;  %s55_s4 = sshll.u32 %s125_s30, 4  ;;  %vm47_vm0 = vcmask 130048   ;;  %s56_s4 = int_to_ptr.vmem [resolvable:$true] %s55_s4 }
  0x15   :  { %34 = vperm.xlu0 %72, %v31_v1   ;;  %v29_v4 = vld [vmem:[#allocation2] sm:$0xff]  ;;  %s95_s0 = scalar_lea.vmem %s56_s4, 256  ;;  %p100_p9 = scmp.lt.s32.totalorder %s56_s4, %s56_s4 }
  0x16   :  { %p96_p8 = scmp.ne.s32.totalorder %s56_s4, %s95_s0  ;;  %p101_p10 = scmp.lt.s32.totalorder %s95_s0, %s95_s0 }
  0x18   :  { %p102_p11 = por %p101_p10, %p100_p9 }
  0x19   :  { %42 = vperm.xlu0 %72, %v39_v2  }
  0x1a   :  { %p103_p12 = pnand %p102_p11, %p96_p8 }
  0x94   :  { %v35_v3 = vpop.permute.xlu0 %34 }
  0x95   :  { %v37_v6 = vmul.f32 %v35_v3, %v29_v4  ;;  %v38_v7 = vmul.f32 %v35_v3, %v30_v5 }
  0x98   :  { %v43_v8 = vpop.permute.xlu0 %42 }
  0x99   :  { %v45_v9 = vadd.f32 %v43_v8, %v37_v6  ;;  %v46_v10 = vadd.f32 %v43_v8, %v38_v7 }
  0x9b   :  { %48 = vst.msk [vmem:[#allocation5] sm:$0xff] %vm47_vm0, %v45_v9  ;;  %49 = vst.msk [vmem:[#allocation5 + $0x8] sm:$0xff] %vm47_vm0, %v46_v10 }
  0x9c   :  { %106 = shalt.err (!%p103_p12)
}
  0x9d   :  { %s107_s5 = scalar_lea.hbm %s185_s3, 256 }
  0x9e   :  { %p108_p13 = scmp.ne.s32.totalorder %s185_s3, %s107_s5  ;;  %p111_p0 = scmp.lt.u32.totalorder %s107_s5, %s185_s3 }
  0xa0   :  { %p113_p1 = pnand %p111_p0, %p108_p13 }
  0xa2   :  { %116 = shalt.err (!%p113_p1)
}
  0xa3   :  { %61 = dma.vmem_to_hbm [thread:$0]  %s56_s4, 256, %s185_s3, [#allocation4], %s122_s22, %s122_s22, %s123_s23  }
  0xa4   :  { %119 = dma.done.wait [#allocation4], 256  }
  0xa5   :  { %120 = vsyncadd [#allocation4], 4294967040 }
  0xa6   :  { %65 = vsyncpa [#allocation3], 1 }
  0xa7   :  { %66 = vsyncpa [#allocation4], 1 }

</bundles_post_ra>
